<compile_context>
chip_gen: v7x
topology: tpu7x:2x2x1
jax: 0.10.0
libtpu: 0.0.40
codegen_flags: <defaults>
</compile_context>

<pallas_src>
import functools

import jax
import jax.numpy as jnp
from jax.experimental import pallas as pl
from jax.experimental.pallas import tpu as pltpu

_LANES = 128


def _round_up(x, m):
    return ((x + m - 1) // m) * m


def _encoder_kernel(n_hidden, out_dim, *refs):
    # refs = [x, (w_i, b_i) * n_hidden, w_head, b_head, out]
    #   w_* are bf16 (in, out_padded); b_* are f32 (1, out_padded).
    #   w_head/b_head are the fused mu||sigma head padded to >=128 lanes.
    h = refs[0][...]  # (tile_b, D_in)
    idx = 1
    for _ in range(n_hidden):
        w = refs[idx][...]        # bf16 (in, out_padded)
        b = refs[idx + 1][...]    # f32  (1, out_padded)
        idx += 2
        acc = jnp.dot(
            h.astype(jnp.bfloat16), w, preferred_element_type=jnp.float32
        )
        h = jnp.maximum(acc + b, 0.0)

    w_head = refs[idx][...]       # bf16 (hidden_padded, head_padded)
    b_head = refs[idx + 1][...]   # f32  (1, head_padded)
    out_ref = refs[idx + 2]       # f32  (tile_b, head_padded)

    z = jnp.dot(
        h.astype(jnp.bfloat16), w_head, preferred_element_type=jnp.float32
    ) + b_head
    # Lanes [0, out_dim) are mu (identity), [out_dim, 2*out_dim) are sigma
    # (exp), the rest is zero padding.  exp is evaluated on the whole vreg and
    # discarded on mu/pad lanes by the select — free filler on the idle EUP.
    lane = jax.lax.broadcasted_iota(jnp.int32, z.shape, dimension=1)
    is_sigma = (lane >= out_dim) & (lane < 2 * out_dim)
    out_ref[...] = jnp.where(is_sigma, jnp.exp(z), z)


def encoder_forward(x, packed_params, out_dim, tile_b=None):
    """x: (B, D_in) float32 or bfloat16.

    packed_params: [w0,b0,...,w_{n-1},b_{n-1}, w_head, b_head] as produced by
    `pack_params` (bf16 weights (in, out_padded), f32 biases (1, out_padded),
    fused & 128-lane-padded mu||sigma head).
    Returns (mu, sigma), each (B, out_dim) float32.
    """
    B, D_in = x.shape
    n_hidden = (len(packed_params) - 2) // 2
    head_pad = packed_params[-1].shape[1]          # padded head width (>=128)
    param_bytes = sum(int(p.size) * p.dtype.itemsize for p in packed_params)

    # Generation-aware VMEM budget (v7x has only 64 MiB physical VMEM).
    try:
        vmem_cap = int(pltpu.get_tpu_info().vmem_capacity_bytes)
    except Exception:
        vmem_cap = 64 << 20
    vmem_budget = max(16 << 20, min(vmem_cap - (16 << 20), 48 << 20))

    x_row_bytes = D_in * x.dtype.itemsize
    out_row_bytes = head_pad * 4

    if tile_b is None:
        # Default: one grid step (tile_b = padded batch) when it fits VMEM —
        # nothing to pipeline at these sizes and per-step overhead dominates
        # on single-TC chips.  Fall back to 256-row tiles otherwise.
        b8 = max(8, _round_up(B, 8))
        need_single = param_bytes + 2 * b8 * (x_row_bytes + out_row_bytes)
        tile_b = b8 if need_single <= vmem_budget else 256
    tile_b = max(8, _round_up(min(tile_b, _round_up(B, 8)), 8))

    # Pad batch up to a multiple of tile_b so no rows are silently dropped.
    b_pad = _round_up(B, tile_b)
    if b_pad != B:
        x = jnp.pad(x, ((0, b_pad - B), (0, 0)))
    grid = (b_pad // tile_b,)

    in_specs = [pl.BlockSpec((tile_b, D_in), lambda i: (i, 0))]
    for p in packed_params:
        # Grid-invariant full-array blocks: weights/biases stay resident.
        in_specs.append(pl.BlockSpec(p.shape, lambda i: (0, 0)))
    out_specs = pl.BlockSpec((tile_b, head_pad), lambda i: (i, 0))

    # Advisory cost estimate for the XLA scheduler (uses padded shapes).
    weight_shapes = [packed_params[2 * i].shape for i in range(n_hidden + 1)]
    flops = 2 * b_pad * sum(m * n for (m, n) in weight_shapes)
    transcendentals = b_pad * head_pad
    bytes_accessed = (int(x.size) * x.dtype.itemsize + param_bytes
                      + b_pad * out_row_bytes)
    cost = pl.CostEstimate(
        flops=flops, transcendentals=transcendentals,
        bytes_accessed=bytes_accessed,
    )

    # Weights are grid-invariant (single-resident); only the x tile and output
    # tile double-buffer.
    vmem_need = param_bytes + 2 * tile_b * (x_row_bytes + out_row_bytes)
    vmem_limit = int(min(max(vmem_need + (4 << 20), 16 << 20), vmem_budget))

    kernel = functools.partial(_encoder_kernel, n_hidden, out_dim)
    fused = pl.pallas_call(
        kernel,
        grid=grid,
        in_specs=in_specs,
        out_specs=out_specs,
        out_shape=jax.ShapeDtypeStruct((b_pad, head_pad), jnp.float32),
        compiler_params=pltpu.CompilerParams(
            dimension_semantics=("parallel",),
            vmem_limit_bytes=vmem_limit,
        ),
        cost_estimate=cost,
    )(x, *packed_params)

    mu = fused[:B, :out_dim]
    sigma = fused[:B, out_dim:2 * out_dim]
    return mu, sigma


def init_encoder_params(key, input_dim, hidden_dims, out_dim):
    """Deterministic init mimicking nn.Linear's U(-1/sqrt(fan_in), 1/sqrt(fan_in)).
    Returns flat f32 list [w0,b0,...,w_mu,b_mu,w_sig,b_sig] with weights stored
    as (in, out) and biases as (1, out)."""
    params = []
    dims = [input_dim] + list(hidden_dims)
    layer_io = [(dims[i], dims[i + 1]) for i in range(len(hidden_dims))]
    layer_io += [(dims[-1], out_dim), (dims[-1], out_dim)]  # fc_mu, fc_sigma
    for fan_in, fan_out in layer_io:
        key, kw, kb = jax.random.split(key, 3)
        bound = 1.0 / jnp.sqrt(fan_in)
        w = jax.random.uniform(kw, (fan_in, fan_out), jnp.float32, -bound, bound)
        b = jax.random.uniform(kb, (1, fan_out), jnp.float32, -bound, bound)
        params += [w, b]
    return params


def pack_params(params):
    """Fuse the mu/sigma heads into one layer, zero-pad every layer's output
    (N) dim to a multiple of 128 lanes (with matching zero rows in the next
    layer's weight) and cast weights to bf16 (biases stay f32).

    Padding is numerically exact: padded bias lanes are 0, so ReLU(0+0)=0, and
    the appended zero weight rows in the following layer absorb the pad."""
    n_hidden = (len(params) - 4) // 2
    layers = [(params[2 * i], params[2 * i + 1]) for i in range(n_hidden)]
    w_mu, b_mu = params[2 * n_hidden], params[2 * n_hidden + 1]
    w_sg, b_sg = params[2 * n_hidden + 2], params[2 * n_hidden + 3]
    layers.append((jnp.concatenate([w_mu, w_sg], axis=1),
                   jnp.concatenate([b_mu, b_sg], axis=1)))

    packed = []
    prev_pad = 0  # zero rows to append on the next layer's input (K) dim
    for (w, b) in layers:
        n = w.shape[1]
        n_pad = _round_up(n, _LANES) - n
        if prev_pad:
            w = jnp.pad(w, ((0, prev_pad), (0, 0)))
        if n_pad:
            w = jnp.pad(w, ((0, 0), (0, n_pad)))
            b = jnp.pad(b, ((0, 0), (0, n_pad)))
        packed.append(w.astype(jnp.bfloat16))
        packed.append(b)
        prev_pad = n_pad
    return packed


def encoder_reference(x, params):
    """Pure-JAX reference matching the PyTorch forward with the same
    bf16-operand / f32-accumulation matmuls as the kernel."""
    n_hidden = (len(params) - 4) // 2
    h = x
    for i in range(n_hidden):
        acc = jnp.dot(
            h.astype(jnp.bfloat16),
            params[2 * i].astype(jnp.bfloat16),
            preferred_element_type=jnp.float32,
        )
        h = jnp.maximum(acc + params[2 * i + 1], 0.0)

    def head(w, b):
        return jnp.dot(
            h.astype(jnp.bfloat16),
            w.astype(jnp.bfloat16),
            preferred_element_type=jnp.float32,
        ) + b

    mu = head(params[2 * n_hidden], params[2 * n_hidden + 1])
    sigma = jnp.exp(head(params[2 * n_hidden + 2], params[2 * n_hidden + 3]))
    return mu, sigma


if __name__ == "__main__":
    # Small shapes for the MLP encoder; default tiling collapses to grid=(1,).
    batch = 256
    input_dim = 64
    hidden_dims = [128, 64]
    out_dim = 16

    key = jax.random.PRNGKey(0)
    key, kx = jax.random.split(key)
    x = jax.random.normal(kx, (batch, input_dim), jnp.float32)
    params = init_encoder_params(key, input_dim, hidden_dims, out_dim)
    packed = pack_params(params)

    mu, sigma = encoder_forward(x, packed, out_dim)
    jax.block_until_ready((mu, sigma))

    mu_ref, sigma_ref = encoder_reference(x, params)
    assert mu.shape == (batch, out_dim) and sigma.shape == (batch, out_dim)
    assert jnp.allclose(mu, mu_ref, atol=1e-3, rtol=1e-3)
    assert jnp.allclose(sigma, sigma_ref, atol=1e-3, rtol=1e-3)
    assert bool(jnp.all(sigma > 0.0))

    print("KERNEL_OK")
</pallas_src>

<mosaic_0001>
module attributes {stable_mosaic.version = 11 : i64} {
  func.func @_encoder_kernel(%arg0: i32, %arg1: memref<256x64xf32, #tpu.memory_space<vmem>>, %arg2: memref<64x128xbf16, #tpu.memory_space<vmem>>, %arg3: memref<1x128xf32, #tpu.memory_space<vmem>>, %arg4: memref<128x128xbf16, #tpu.memory_space<vmem>>, %arg5: memref<1x128xf32, #tpu.memory_space<vmem>>, %arg6: memref<128x128xbf16, #tpu.memory_space<vmem>>, %arg7: memref<1x128xf32, #tpu.memory_space<vmem>>, %arg8: memref<256x128xf32, #tpu.memory_space<vmem>>) attributes {dimension_semantics = [#tpu.dimension_semantics<parallel>], iteration_bounds = array<i64: 1>, scalar_prefetch = 0 : i64, scratch_operands = 0 : i64, tpu.core_type = #tpu.core_type<tc>, window_params = [{transform_indices = @transform_0, window_bounds = array<i64: 256, 64>}, {pipeline_mode = #tpu.pipeline_mode<synchronous>, transform_indices = @transform_1, window_bounds = array<i64: 64, 128>}, {pipeline_mode = #tpu.pipeline_mode<synchronous>, transform_indices = @transform_2, window_bounds = array<i64: 1, 128>}, {pipeline_mode = #tpu.pipeline_mode<synchronous>, transform_indices = @transform_3, window_bounds = array<i64: 128, 128>}, {pipeline_mode = #tpu.pipeline_mode<synchronous>, transform_indices = @transform_4, window_bounds = array<i64: 1, 128>}, {pipeline_mode = #tpu.pipeline_mode<synchronous>, transform_indices = @transform_5, window_bounds = array<i64: 128, 128>}, {pipeline_mode = #tpu.pipeline_mode<synchronous>, transform_indices = @transform_6, window_bounds = array<i64: 1, 128>}, {transform_indices = @transform_7, window_bounds = array<i64: 256, 128>}]} {
    %c0 = arith.constant 0 : index
    %c0_0 = arith.constant 0 : index
    %0 = vector.load %arg1[%c0, %c0_0] : memref<256x64xf32, #tpu.memory_space<vmem>>, vector<256x64xf32>
    %c0_1 = arith.constant 0 : index
    %c0_2 = arith.constant 0 : index
    %1 = vector.load %arg2[%c0_1, %c0_2] : memref<64x128xbf16, #tpu.memory_space<vmem>>, vector<64x128xbf16>
    %c0_3 = arith.constant 0 : index
    %c0_4 = arith.constant 0 : index
    %2 = vector.load %arg3[%c0_3, %c0_4] : memref<1x128xf32, #tpu.memory_space<vmem>>, vector<1x128xf32>
    %3 = arith.truncf %0 : vector<256x64xf32> to vector<256x64xbf16>
    %cst = arith.constant dense<0.000000e+00> : vector<256x128xf32>
    %4 = tpu.matmul %3, %1, %cst {dimension_numbers = #tpu.dot_dimension_numbers<[1], [0], [0], [1], [0, 0, 1, 1], [], []>} : vector<256x64xbf16>, vector<64x128xbf16>, vector<256x128xf32> -> vector<256x128xf32>
    %5 = vector.broadcast %2 : vector<1x128xf32> to vector<256x128xf32>
    %6 = arith.addf %4, %5 : vector<256x128xf32>
    %cst_5 = arith.constant 0.000000e+00 : f32
    %7 = vector.broadcast %cst_5 : f32 to vector<256x128xf32>
    %8 = arith.maximumf %6, %7 : vector<256x128xf32>
    %c0_6 = arith.constant 0 : index
    %c0_7 = arith.constant 0 : index
    %9 = vector.load %arg4[%c0_6, %c0_7] : memref<128x128xbf16, #tpu.memory_space<vmem>>, vector<128x128xbf16>
    %c0_8 = arith.constant 0 : index
    %c0_9 = arith.constant 0 : index
    %10 = vector.load %arg5[%c0_8, %c0_9] : memref<1x128xf32, #tpu.memory_space<vmem>>, vector<1x128xf32>
    %11 = arith.truncf %8 : vector<256x128xf32> to vector<256x128xbf16>
    %cst_10 = arith.constant dense<0.000000e+00> : vector<256x128xf32>
    %12 = tpu.matmul %11, %9, %cst_10 {dimension_numbers = #tpu.dot_dimension_numbers<[1], [0], [0], [1], [0, 0, 1, 1], [], []>} : vector<256x128xbf16>, vector<128x128xbf16>, vector<256x128xf32> -> vector<256x128xf32>
    %13 = vector.broadcast %10 : vector<1x128xf32> to vector<256x128xf32>
    %14 = arith.addf %12, %13 : vector<256x128xf32>
    %cst_11 = arith.constant 0.000000e+00 : f32
    %15 = vector.broadcast %cst_11 : f32 to vector<256x128xf32>
    %16 = arith.maximumf %14, %15 : vector<256x128xf32>
    %c0_12 = arith.constant 0 : index
    %c0_13 = arith.constant 0 : index
    %17 = vector.load %arg6[%c0_12, %c0_13] : memref<128x128xbf16, #tpu.memory_space<vmem>>, vector<128x128xbf16>
    %c0_14 = arith.constant 0 : index
    %c0_15 = arith.constant 0 : index
    %18 = vector.load %arg7[%c0_14, %c0_15] : memref<1x128xf32, #tpu.memory_space<vmem>>, vector<1x128xf32>
    %19 = arith.truncf %16 : vector<256x128xf32> to vector<256x128xbf16>
    %cst_16 = arith.constant dense<0.000000e+00> : vector<256x128xf32>
    %20 = tpu.matmul %19, %17, %cst_16 {dimension_numbers = #tpu.dot_dimension_numbers<[1], [0], [0], [1], [0, 0, 1, 1], [], []>} : vector<256x128xbf16>, vector<128x128xbf16>, vector<256x128xf32> -> vector<256x128xf32>
    %21 = vector.broadcast %18 : vector<1x128xf32> to vector<256x128xf32>
    %22 = arith.addf %20, %21 : vector<256x128xf32>
    %23 = tpu.iota {dimensions = array<i32: 1>} : vector<256x128xi32>
    %c16_i32 = arith.constant 16 : i32
    %24 = vector.broadcast %c16_i32 : i32 to vector<256x128xi32>
    %25 = arith.cmpi sge, %23, %24 : vector<256x128xi32>
    %c32_i32 = arith.constant 32 : i32
    %26 = vector.broadcast %c32_i32 : i32 to vector<256x128xi32>
    %27 = arith.cmpi slt, %23, %26 : vector<256x128xi32>
    %28 = arith.andi %25, %27 : vector<256x128xi1>
    %29 = math.exp %22 : vector<256x128xf32>
    %30 = arith.select %28, %29, %22 : vector<256x128xi1>, vector<256x128xf32>
    %c0_17 = arith.constant 0 : index
    %c0_18 = arith.constant 0 : index
    %31 = vector.load %arg8[%c0_17, %c0_18] : memref<256x128xf32, #tpu.memory_space<vmem>>, vector<256x128xf32>
    tpu.vector_store %arg8[%c0_17, %c0_18], %30 {strides = array<i32>} : memref<256x128xf32, #tpu.memory_space<vmem>>, vector<256x128xf32>,
    return
  }
  func.func @transform_0(%arg0: i32) -> (i32, i32) {
    %c0_i32 = arith.constant 0 : i32
    %c0_i32_0 = arith.constant 0 : i32
    return %arg0, %c0_i32 : i32, i32
  }
  func.func @transform_1(%arg0: i32) -> (i32, i32) {
    %c0_i32 = arith.constant 0 : i32
    %c0_i32_0 = arith.constant 0 : i32
    %c0_i32_1 = arith.constant 0 : i32
    return %c0_i32, %c0_i32_0 : i32, i32
  }
  func.func @transform_2(%arg0: i32) -> (i32, i32) {
    %c0_i32 = arith.constant 0 : i32
    %c0_i32_0 = arith.constant 0 : i32
    %c0_i32_1 = arith.constant 0 : i32
    return %c0_i32, %c0_i32_0 : i32, i32
  }
  func.func @transform_3(%arg0: i32) -> (i32, i32) {
    %c0_i32 = arith.constant 0 : i32
    %c0_i32_0 = arith.constant 0 : i32
    %c0_i32_1 = arith.constant 0 : i32
    return %c0_i32, %c0_i32_0 : i32, i32
  }
  func.func @transform_4(%arg0: i32) -> (i32, i32) {
    %c0_i32 = arith.constant 0 : i32
    %c0_i32_0 = arith.constant 0 : i32
    %c0_i32_1 = arith.constant 0 : i32
    return %c0_i32, %c0_i32_0 : i32, i32
  }
  func.func @transform_5(%arg0: i32) -> (i32, i32) {
    %c0_i32 = arith.constant 0 : i32
    %c0_i32_0 = arith.constant 0 : i32
    %c0_i32_1 = arith.constant 0 : i32
    return %c0_i32, %c0_i32_0 : i32, i32
  }
  func.func @transform_6(%arg0: i32) -> (i32, i32) {
    %c0_i32 = arith.constant 0 : i32
    %c0_i32_0 = arith.constant 0 : i32
    %c0_i32_1 = arith.constant 0 : i32
    return %c0_i32, %c0_i32_0 : i32, i32
  }
  func.func @transform_7(%arg0: i32) -> (i32, i32) {
    %c0_i32 = arith.constant 0 : i32
    %c0_i32_0 = arith.constant 0 : i32
    return %arg0, %c0_i32 : i32, i32
  }
}

</mosaic_0001>

<bundles_post_ra>
// kernel: tpu_custom_call.1
= control target key start
LH: loop header
LB: loop body
LE: loop exit
PB: predicated region body
PF: predicated region fallthrough
CT: control target
= control target key end

     0   :  { %vm115_vm0 = vcmask 523264   ;;  %s1811_s0 = inlined_call_operand.vmem [shape: f32[256,64], index: 0, kind: input, shape index: {}]   ;;  %s1812_s1 = inlined_call_operand.vmem [shape: bf16[64,128], index: 1, kind: input, shape index: {}]   ;;  %s1813_s2 = inlined_call_operand.vmem [shape: f32[1,128], index: 2, kind: input, shape index: {}]   ;;  %s1814_s3 = inlined_call_operand.vmem [shape: bf16[128,128], index: 3, kind: input, shape index: {}]   ;;  %s1815_s4 = inlined_call_operand.vmem [shape: f32[1,128], index: 4, kind: input, shape index: {}]   ;;  %s1816_s5 = inlined_call_operand.vmem [shape: bf16[128,128], index: 5, kind: input, shape index: {}]   ;;  %s1817_s6 = inlined_call_operand.vmem [shape: f32[1,128], index: 6, kind: input, shape index: {}]   ;;  %s1818_s7 = inlined_call_operand.hbm [shape: f32[256,128], index: 7, kind: output, shape index: {}]  }
   0x1   :  { %v1288_v0 = vld [vmem:[%s1812_s1] sm:$0xff]   ;;  %v1289_v1 = vld [vmem:[%s1812_s1 + $0x8] sm:$0xff]   ;;  %v1290_v2 = vld [vmem:[%s1812_s1 + $0x10] sm:$0xff]  }
   0x2   :  { %1141 = vmatprep.subr.bf16.mxu0 %v1288_v0  ;;  %1277 = vmatprep.subr.bf16.mxu1 %v1288_v0  ;;  %v28_v3 = vld [vmem:[%s1811_s0] sm:$0xff]  ;;  %v29_v4 = vld [vmem:[%s1811_s0 + $0x8] sm:$0xff]  ;;  %v1291_v6 = vld [vmem:[%s1812_s1 + $0x18] sm:$0xff]  }
   0x3   :  { %1142 = vmatpush3.bf16.msra.mxu0 %v1288_v0  ;;  %1281 = vmatpush3.bf16.msra.mxu1 %v1288_v0  ;;  %v69_v5 = vpack.c.bf16 %v29_v4, %v28_v3  ;;  %v44_v7 = vld [vmem:[%s1811_s0 + $0x80] sm:$0xff]  ;;  %v45_v8 = vld [vmem:[%s1811_s0 + $0x88] sm:$0xff]  ;;  %v30_v10 = vld [vmem:[%s1811_s0 + $0x10] sm:$0xff] }
   0x4   :  { %1143 = vmatprep.subr.bf16.mxu0 %v1289_v1  ;;  %1278 = vmatprep.subr.bf16.mxu1 %v1289_v1  ;;  %v77_v9 = vpack.c.bf16 %v45_v8, %v44_v7  ;;  %v31_v11 = vld [vmem:[%s1811_s0 + $0x18] sm:$0xff]  ;;  %v32_v12 = vld [vmem:[%s1811_s0 + $0x20] sm:$0xff]  ;;  %v33_v13 = vld [vmem:[%s1811_s0 + $0x28] sm:$0xff] }
   0x5   :  { %1149 = vmatprep.mubr.msk.bf16.mxu0 %vm115_vm0, %v69_v5  ;;  %v46_v14 = vld [vmem:[%s1811_s0 + $0x90] sm:$0xff]  ;;  %v47_v15 = vld [vmem:[%s1811_s0 + $0x98] sm:$0xff]  ;;  %v48_v16 = vld [vmem:[%s1811_s0 + $0xa0] sm:$0xff]  ;;  %v70_v18 = vpack.c.bf16 %v31_v11, %v30_v10  ;;  %v71_v19 = vpack.c.bf16 %v33_v13, %v32_v12 }
   0x6   :  { %1165 = vmatprep.mubr.msk.bf16.mxu1 %vm115_vm0, %v77_v9  ;;  %v49_v17 = vld [vmem:[%s1811_s0 + $0xa8] sm:$0xff]  ;;  %v78_v20 = vpack.c.bf16 %v47_v15, %v46_v14  ;;  %v1292_v21 = vld [vmem:[%s1814_s3] sm:$0xff]   ;;  %v34_v23 = vld [vmem:[%s1811_s0 + $0x30] sm:$0xff] }
   0x7   :  { %1144 = vmatpush3.bf16.msra.mxu0 %v1289_v1  ;;  %1282 = vmatpush3.bf16.msra.mxu1 %v1289_v1  ;;  %v79_v22 = vpack.c.bf16 %v49_v17, %v48_v16  ;;  %v35_v24 = vld [vmem:[%s1811_s0 + $0x38] sm:$0xff]  ;;  %v1293_v25 = vld [vmem:[%s1814_s3 + $0x8] sm:$0xff]   ;;  %v36_v26 = vld [vmem:[%s1811_s0 + $0x40] sm:$0xff] }
   0x8   :  { %1145 = vmatprep.subr.bf16.mxu0 %v1290_v2  ;;  %1279 = vmatprep.subr.bf16.mxu1 %v1290_v2  ;;  %v37_v27 = vld [vmem:[%s1811_s0 + $0x48] sm:$0xff]  ;;  %v50_v28 = vld [vmem:[%s1811_s0 + $0xb0] sm:$0xff]  ;;  %v51_v29 = vld [vmem:[%s1811_s0 + $0xb8] sm:$0xff]  ;;  %v72_v33 = vpack.c.bf16 %v35_v24, %v34_v23 }
   0x9   :  { %v52_v30 = vld [vmem:[%s1811_s0 + $0xc0] sm:$0xff]  ;;  %v53_v31 = vld [vmem:[%s1811_s0 + $0xc8] sm:$0xff]  ;;  %v1294_v32 = vld [vmem:[%s1814_s3 + $0x10] sm:$0xff]   ;;  %v73_v34 = vpack.c.bf16 %v37_v27, %v36_v26  ;;  %v80_v35 = vpack.c.bf16 %v51_v29, %v50_v28 }
   0xa   :  { %v1295_v36 = vld [vmem:[%s1814_s3 + $0x18] sm:$0xff]   ;;  %v81_v37 = vpack.c.bf16 %v53_v31, %v52_v30  ;;  %v38_v38 = vld [vmem:[%s1811_s0 + $0x50] sm:$0xff]  ;;  %v40_v40 = vld [vmem:[%s1811_s0 + $0x60] sm:$0xff] }
   0xb   :  { %1146 = vmatpush3.bf16.msra.mxu0 %v1290_v2  ;;  %1283 = vmatpush3.bf16.msra.mxu1 %v1290_v2  ;;  %v39_v39 = vld [vmem:[%s1811_s0 + $0x58] sm:$0xff] }
   0xc   :  { %1147 = vmatprep.subr.bf16.mxu0 %v1291_v6  ;;  %1280 = vmatprep.subr.bf16.mxu1 %v1291_v6 }
   0xf   :  { %1148 = vmatpush3.bf16.msra.mxu0 %v1291_v6  ;;  %1284 = vmatpush3.bf16.msra.mxu1 %v1291_v6 }
  0x10   :  { %1181 = vmatprep.subr.bf16.mxu1 %v1292_v21 }
  0x12   :  { %1150 = vmatmul.mubr.msk.bf16.vlgmr.msra.gmra.mrb[0].mxu0 %vm115_vm0, %v70_v18  ;;  %1166 = vmatmul.mubr.msk.bf16.vlgmr.msra.gmra.mrb[0].mxu1 %vm115_vm0, %v78_v20 }
  0x13   :  { %1153 = vmatprep.mubr.msk.bf16.mxu0 %vm115_vm0, %v71_v19  ;;  %1169 = vmatprep.mubr.msk.bf16.mxu1 %vm115_vm0, %v79_v22 }
  0x14   :  { %1182 = vmatpush3.bf16.msra.mxu1 %v1292_v21 }
  0x15   :  { %1183 = vmatprep.subr.bf16.mxu1 %v1293_v25 }
  0x18   :  { %1184 = vmatpush3.bf16.msra.mxu1 %v1293_v25 }
  0x19   :  { %1185 = vmatprep.subr.bf16.mxu1 %v1294_v32 }
  0x1a   :  { %1154 = vmatmul.mubr.msk.bf16.gmra.mrb[4].mxu0 %vm115_vm0, %v72_v33  ;;  %1170 = vmatmul.mubr.msk.bf16.gmra.mrb[4].mxu1 %vm115_vm0, %v80_v35 }
  0x1b   :  { %1157 = vmatprep.mubr.msk.bf16.mxu0 %vm115_vm0, %v73_v34 }
  0x1c   :  { %12 = vsyncpa [#allocation3], 0  ;;  %v41_v41 = vld [vmem:[%s1811_s0 + $0x68] sm:$0xff]  ;;  %1173 = vmatprep.mubr.msk.bf16.mxu1 %vm115_vm0, %v81_v37  ;;  %v54_v42 = vld [vmem:[%s1811_s0 + $0xd0] sm:$0xff]  ;;  %1186 = vmatpush3.bf16.msra.mxu1 %v1294_v32  ;;  %v74_v47 = vpack.c.bf16 %v39_v39, %v38_v38 }
  0x1d   :  { %v55_v43 = vld [vmem:[%s1811_s0 + $0xd8] sm:$0xff]  ;;  %v56_v44 = vld [vmem:[%s1811_s0 + $0xe0] sm:$0xff]  ;;  %v57_v45 = vld [vmem:[%s1811_s0 + $0xe8] sm:$0xff]  ;;  %1187 = vmatprep.subr.bf16.mxu1 %v1295_v36  ;;  %v75_v48 = vpack.c.bf16 %v41_v41, %v40_v40 }
  0x1e   :  { %v1296_v46 = vld [vmem:[%s1814_s3 + $0x20] sm:$0xff]   ;;  %v82_v49 = vpack.c.bf16 %v55_v43, %v54_v42  ;;  %v83_v50 = vpack.c.bf16 %v57_v45, %v56_v44  ;;  %v1297_v51 = vld [vmem:[%s1814_s3 + $0x28] sm:$0xff]   ;;  %v42_v52 = vld [vmem:[%s1811_s0 + $0x70] sm:$0xff] }
  0x1f   :  { %v43_v53 = vld [vmem:[%s1811_s0 + $0x78] sm:$0xff]  ;;  %v58_v54 = vld [vmem:[%s1811_s0 + $0xf0] sm:$0xff]  ;;  %v1300_v60 = vld [vmem:[%s1816_s5] sm:$0xff]  }
  0x20   :  { %1188 = vmatpush3.bf16.msra.mxu1 %v1295_v36  ;;  %v59_v55 = vld [vmem:[%s1811_s0 + $0xf8] sm:$0xff]  ;;  %v76_v56 = vpack.c.bf16 %v43_v53, %v42_v52  ;;  %v1298_v58 = vld [vmem:[%s1814_s3 + $0x30] sm:$0xff]   ;;  %v1301_v61 = vld [vmem:[%s1816_s5 + $0x8] sm:$0xff]   ;;  %1229 = vmatprep.subr.bf16.mxu0 %v1300_v60 }
  0x21   :  { %1189 = vmatprep.subr.bf16.mxu1 %v1296_v46  ;;  %v84_v57 = vpack.c.bf16 %v59_v55, %v58_v54  ;;  %v1299_v59 = vld [vmem:[%s1814_s3 + $0x38] sm:$0xff]   ;;  %1230 = vmatpush3.bf16.msra.mxu0 %v1300_v60  ;;  %v1302_v62 = vld [vmem:[%s1816_s5 + $0x10] sm:$0xff]   ;;  %v1304_v0 = vld [vmem:[%s1816_s5 + $0x20] sm:$0xff]  }
  0x22   :  { %1158 = vmatmul.mubr.msk.bf16.gmra.mrb[8].mxu0 %vm115_vm0, %v74_v47  ;;  %1174 = vmatmul.mubr.msk.bf16.gmra.mrb[8].mxu1 %vm115_vm0, %v82_v49  ;;  %v1303_v63 = vld [vmem:[%s1816_s5 + $0x18] sm:$0xff]   ;;  %v1305_v1 = vld [vmem:[%s1816_s5 + $0x28] sm:$0xff]   ;;  %v1608_v2 = vld [vmem:[%s1813_s2] ss:$0 sm:$0xff] }
  0x23   :  { %1161 = vmatprep.mubr.msk.bf16.mxu0 %vm115_vm0, %v75_v48  ;;  %1177 = vmatprep.mubr.msk.bf16.mxu1 %vm115_vm0, %v83_v50 }
  0x24   :  { %1190 = vmatpush3.bf16.msra.mxu1 %v1296_v46  ;;  %1231 = vmatprep.subr.bf16.mxu0 %v1301_v61 }
  0x25   :  { %1191 = vmatprep.subr.bf16.mxu1 %v1297_v51  ;;  %1232 = vmatpush3.bf16.msra.mxu0 %v1301_v61 }
  0x26   :  { %1233 = vmatprep.subr.bf16.mxu0 %v1302_v62 }
  0x28   :  { %1192 = vmatpush3.bf16.msra.mxu1 %v1297_v51 }
  0x29   :  { %1193 = vmatprep.subr.bf16.mxu1 %v1298_v58  ;;  %1234 = vmatpush3.bf16.msra.mxu0 %v1302_v62 }
  0x2a   :  { %1162 = vmatmul.mubr.msk.bf16.gmra.mrb[12].mxu0 %vm115_vm0, %v76_v56  ;;  %1178 = vmatmul.mubr.msk.bf16.gmra.mrb[12].mxu1 %vm115_vm0, %v84_v57 }
  0x2b   :  { %1235 = vmatprep.subr.bf16.mxu0 %v1303_v63 }
  0x2c   :  { %1194 = vmatpush3.bf16.msra.mxu1 %v1298_v58 }
  0x2d   :  { %1195 = vmatprep.subr.bf16.mxu1 %v1299_v59  ;;  %1236 = vmatpush3.bf16.msra.mxu0 %v1303_v63 }
  0x2e   :  { %1237 = vmatprep.subr.bf16.mxu0 %v1304_v0 }
  0x30   :  { %1196 = vmatpush3.bf16.msra.mxu1 %v1299_v59 }
  0x31   :  { %1238 = vmatpush3.bf16.msra.mxu0 %v1304_v0 }
  0x32   :  { %1239 = vmatprep.subr.bf16.mxu0 %v1305_v1 }
  0x35   :  { %1240 = vmatpush3.bf16.msra.mxu0 %v1305_v1 }
  0xe5   :  { %v1151_v3 = vpop.f32.mrb[0].mxu0  ;;  %v1167_v6 = vpop.f32.mrb[0].mxu1 }
  0xe6   :  { %v207_v4 = vadd.f32 %v1151_v3, %v1608_v2  ;;  %v198_v5 = vpop.f32.mrb[1].mxu0  ;;  %v271_v9 = vadd.f32 %v1167_v6, %v1608_v2  ;;  %v262_v10 = vpop.f32.mrb[1].mxu1 }
  0xe7   :  { %v199_v7 = vadd.f32 %v1608_v2, %v198_v5  ;;  %v1152_v8 = vpop.f32.mrb[2].mxu0  ;;  %v263_v13 = vadd.f32 %v1608_v2, %v262_v10  ;;  %v1168_v14 = vpop.f32.mrb[2].mxu1 }
  0xe8   :  { %v210_v11 = vadd.f32 %v1152_v8, %v1608_v2  ;;  %v201_v12 = vpop.f32.mrb[3].mxu0  ;;  %v343_v16 = vmax.f32 %v271_v9, 0.0  ;;  %v274_v17 = vadd.f32 %v1168_v14, %v1608_v2  ;;  %v265_v18 = vpop.f32.mrb[3].mxu1  ;;  %v327_v19 = vmax.f32 %v207_v4, 0.0 }
  0xe9   :  { %v202_v15 = vadd.f32 %v1608_v2, %v201_v12  ;;  %v341_v21 = vmax.f32 %v263_v13, 0.0  ;;  %v266_v22 = vadd.f32 %v1608_v2, %v265_v18  ;;  %v325_v23 = vmax.f32 %v199_v7, 0.0 }
  0xea   :  { %v328_v20 = vmax.f32 %v210_v11, 0.0  ;;  %v344_v25 = vmax.f32 %v274_v17, 0.0 }
  0xeb   :  { %v326_v24 = vmax.f32 %v202_v15, 0.0  ;;  %v342_v27 = vmax.f32 %v266_v22, 0.0 }
  0xec   :  { %v375_v26 = vpack.c.bf16 %v328_v20, %v327_v19  ;;  %v1618_v30 = vpack.c.bf16 %v344_v25, %v343_v16 }
  0xed   :  { %v374_v28 = vpack.c.bf16 %v326_v24, %v325_v23  ;;  %v1155_v29 = vpop.f32.mrb[4].mxu0  ;;  %v1621_v33 = vpack.c.bf16 %v342_v27, %v341_v21  ;;  %v1171_v34 = vpop.f32.mrb[4].mxu1 }
  0xee   :  { %v223_v31 = vadd.f32 %v1155_v29, %v1608_v2  ;;  %v214_v32 = vpop.f32.mrb[5].mxu0  ;;  %v287_v37 = vadd.f32 %v1171_v34, %v1608_v2  ;;  %v278_v38 = vpop.f32.mrb[5].mxu1 }
  0xef   :  { %v215_v35 = vadd.f32 %v1608_v2, %v214_v32  ;;  %v1156_v36 = vpop.f32.mrb[6].mxu0  ;;  %1197 = vmatprep.mubr.bf16.mxu1 %v374_v28  ;;  %v279_v41 = vadd.f32 %v1608_v2, %v278_v38  ;;  %v1172_v42 = vpop.f32.mrb[6].mxu1 }
  0xf0   :  { %v226_v39 = vadd.f32 %v1156_v36, %v1608_v2  ;;  %v217_v40 = vpop.f32.mrb[7].mxu0  ;;  %1198 = vmatmul.mubr.bf16.vlgmr.msra.gmra.mrb[16].mxu1 %v375_v26  ;;  %v347_v44 = vmax.f32 %v287_v37, 0.0  ;;  %v290_v45 = vadd.f32 %v1172_v42, %v1608_v2  ;;  %v281_v46 = vpop.f32.mrb[7].mxu1  ;;  %v331_v47 = vmax.f32 %v223_v31, 0.0 }
  0xf1   :  { %v218_v43 = vadd.f32 %v1608_v2, %v217_v40  ;;  %v345_v49 = vmax.f32 %v279_v41, 0.0  ;;  %v282_v50 = vadd.f32 %v1608_v2, %v281_v46  ;;  %v329_v51 = vmax.f32 %v215_v35, 0.0 }
  0xf2   :  { %v332_v48 = vmax.f32 %v226_v39, 0.0  ;;  %v348_v53 = vmax.f32 %v290_v45, 0.0 }
  0xf3   :  { %v330_v52 = vmax.f32 %v218_v43, 0.0  ;;  %v346_v55 = vmax.f32 %v282_v50, 0.0 }
  0xf4   :  { %v377_v54 = vpack.c.bf16 %v332_v48, %v331_v47  ;;  %v1630_v58 = vpack.c.bf16 %v348_v53, %v347_v44 }
  0xf5   :  { %v376_v56 = vpack.c.bf16 %v330_v52, %v329_v51  ;;  %v1159_v57 = vpop.f32.mrb[8].mxu0  ;;  %v384_v61 = vpack.c.bf16 %v346_v55, %v345_v49  ;;  %v1175_v62 = vpop.f32.mrb[8].mxu1 }
  0xf6   :  { %v239_v59 = vadd.f32 %v1159_v57, %v1608_v2  ;;  %v230_v60 = vpop.f32.mrb[9].mxu0  ;;  %v303_v1 = vadd.f32 %v1175_v62, %v1608_v2  ;;  %v294_v3 = vpop.f32.mrb[9].mxu1 }
  0xf7   :  { %v231_v63 = vadd.f32 %v1608_v2, %v230_v60  ;;  %v1160_v0 = vpop.f32.mrb[10].mxu0  ;;  %1201 = vmatprep.mubr.bf16.mxu1 %v376_v56  ;;  %v295_v6 = vadd.f32 %v1608_v2, %v294_v3  ;;  %v1176_v7 = vpop.f32.mrb[10].mxu1 }
  0xf8   :  { %v242_v4 = vadd.f32 %v1160_v0, %v1608_v2  ;;  %v233_v5 = vpop.f32.mrb[11].mxu0  ;;  %1202 = vmatmul.mubr.bf16.gmra.mrb[20].mxu1 %v377_v54  ;;  %v351_v9 = vmax.f32 %v303_v1, 0.0  ;;  %v306_v10 = vadd.f32 %v1176_v7, %v1608_v2  ;;  %v297_v11 = vpop.f32.mrb[11].mxu1  ;;  %v335_v12 = vmax.f32 %v239_v59, 0.0  ;;  %v1307_v54 = vld [vmem:[%s1816_s5 + $0x38] sm:$0xff]  }
  0xf9   :  { %v234_v8 = vadd.f32 %v1608_v2, %v233_v5  ;;  %v349_v14 = vmax.f32 %v295_v6, 0.0  ;;  %v298_v15 = vadd.f32 %v1608_v2, %v297_v11  ;;  %v333_v16 = vmax.f32 %v231_v63, 0.0 }
  0xfa   :  { %v336_v13 = vmax.f32 %v242_v4, 0.0  ;;  %v352_v18 = vmax.f32 %v306_v10, 0.0 }
  0xfb   :  { %v334_v17 = vmax.f32 %v234_v8, 0.0  ;;  %v350_v20 = vmax.f32 %v298_v15, 0.0 }
  0xfc   :  { %v379_v19 = vpack.c.bf16 %v336_v13, %v335_v12  ;;  %v387_v23 = vpack.c.bf16 %v352_v18, %v351_v9 }
  0xfd   :  { %v378_v21 = vpack.c.bf16 %v334_v17, %v333_v16  ;;  %v1163_v22 = vpop.f32.mrb[12].mxu0  ;;  %v386_v26 = vpack.c.bf16 %v350_v20, %v349_v14  ;;  %v1179_v27 = vpop.f32.mrb[12].mxu1 }
  0xfe   :  { %v255_v24 = vadd.f32 %v1163_v22, %v1608_v2  ;;  %v246_v25 = vpop.f32.mrb[13].mxu0  ;;  %v319_v31 = vadd.f32 %v1179_v27, %v1608_v2  ;;  %v310_v32 = vpop.f32.mrb[13].mxu1 }
  0xff   :  { %v247_v28 = vadd.f32 %v1608_v2, %v246_v25  ;;  %v1164_v29 = vpop.f32.mrb[14].mxu0  ;;  %1205 = vmatprep.mubr.bf16.mxu1 %v378_v21  ;;  %v311_v36 = vadd.f32 %v1608_v2, %v310_v32  ;;  %v1180_v37 = vpop.f32.mrb[14].mxu1 }
 0x100   :  { %v258_v34 = vadd.f32 %v1164_v29, %v1608_v2  ;;  %v249_v35 = vpop.f32.mrb[15].mxu0  ;;  %1206 = vmatmul.mubr.bf16.gmra.mrb[24].mxu1 %v379_v19  ;;  %v355_v39 = vmax.f32 %v319_v31, 0.0  ;;  %v322_v40 = vadd.f32 %v1180_v37, %v1608_v2  ;;  %v313_v41 = vpop.f32.mrb[15].mxu1  ;;  %v339_v42 = vmax.f32 %v255_v24, 0.0 }
 0x101   :  { %v250_v38 = vadd.f32 %v1608_v2, %v249_v35  ;;  %v353_v44 = vmax.f32 %v311_v36, 0.0  ;;  %v314_v45 = vadd.f32 %v1608_v2, %v313_v41  ;;  %v337_v46 = vmax.f32 %v247_v28, 0.0  ;;  %v1306_v2 = vld [vmem:[%s1816_s5 + $0x30] sm:$0xff]  }
 0x102   :  { %v340_v43 = vmax.f32 %v258_v34, 0.0  ;;  %v356_v48 = vmax.f32 %v322_v40, 0.0  ;;  %1241 = vmatprep.subr.bf16.mxu0 %v1306_v2 }
 0x103   :  { %v338_v47 = vmax.f32 %v250_v38, 0.0  ;;  %v354_v50 = vmax.f32 %v314_v45, 0.0  ;;  %1242 = vmatpush3.bf16.msra.mxu0 %v1306_v2 }
 0x104   :  { %v381_v49 = vpack.c.bf16 %v340_v43, %v339_v42  ;;  %v389_v52 = vpack.c.bf16 %v356_v48, %v355_v39  ;;  %1243 = vmatprep.subr.bf16.mxu0 %v1307_v54 }
 0x105   :  { %v380_v51 = vpack.c.bf16 %v338_v47, %v337_v46  ;;  %v388_v53 = vpack.c.bf16 %v354_v50, %v353_v44 }
 0x107   :  { %1209 = vmatprep.mubr.bf16.mxu1 %v380_v51  ;;  %1244 = vmatpush3.bf16.msra.mxu0 %v1307_v54 }
 0x108   :  { %1210 = vmatmul.mubr.bf16.gmra.mrb[28].mxu1 %v381_v49 }
 0x109   :  { %1213 = vmatprep.mubr.bf16.mxu1 %v1621_v33 }
 0x110   :  { %1214 = vmatmul.mubr.bf16.gmra.mrb[32].mxu1 %v1618_v30  ;;  %v1660_v30 = vld [vmem:[%s1815_s4] ss:$0 sm:$0xff] }
 0x111   :  { %1217 = vmatprep.mubr.bf16.mxu1 %v384_v61 }
 0x118   :  { %1218 = vmatmul.mubr.bf16.gmra.mrb[36].mxu1 %v1630_v58 }
 0x119   :  { %1221 = vmatprep.mubr.bf16.mxu1 %v386_v26 }
 0x120   :  { %1222 = vmatmul.mubr.bf16.gmra.mrb[40].mxu1 %v387_v23 }
 0x121   :  { %1225 = vmatprep.mubr.bf16.mxu1 %v388_v53 }
 0x128   :  { %1226 = vmatmul.mubr.bf16.gmra.mrb[44].mxu1 %v389_v52 }
 0x1c3   :  { %v1199_v33 = vpop.f32.mrb[16].mxu1 }
 0x1c4   :  { %v487_v55 = vadd.f32 %v1199_v33, %v1660_v30  ;;  %v478_v56 = vpop.f32.mrb[17].mxu1 }
 0x1c5   :  { %v479_v57 = vadd.f32 %v1660_v30, %v478_v56  ;;  %v1200_v58 = vpop.f32.mrb[18].mxu1 }
 0x1c6   :  { %v490_v59 = vadd.f32 %v1200_v58, %v1660_v30  ;;  %v481_v60 = vpop.f32.mrb[19].mxu1  ;;  %v607_v62 = vmax.f32 %v487_v55, 0.0 }
 0x1c7   :  { %v482_v61 = vadd.f32 %v1660_v30, %v481_v60  ;;  %v605_v0 = vmax.f32 %v479_v57, 0.0 }
 0x1c8   :  { %v608_v63 = vmax.f32 %v490_v59, 0.0 }
 0x1c9   :  { %v606_v1 = vmax.f32 %v482_v61, 0.0 }
 0x1ca   :  { %v655_v3 = vpack.c.bf16 %v608_v63, %v607_v62 }
 0x1cb   :  { %v654_v4 = vpack.c.bf16 %v606_v1, %v605_v0  ;;  %v1203_v5 = vpop.f32.mrb[20].mxu1 }
 0x1cc   :  { %v503_v6 = vadd.f32 %v1203_v5, %v1660_v30  ;;  %v494_v7 = vpop.f32.mrb[21].mxu1 }
 0x1cd   :  { %v495_v8 = vadd.f32 %v1660_v30, %v494_v7  ;;  %v1204_v9 = vpop.f32.mrb[22].mxu1  ;;  %1245 = vmatprep.mubr.bf16.mxu0 %v654_v4 }
 0x1ce   :  { %v506_v10 = vadd.f32 %v1204_v9, %v1660_v30  ;;  %v497_v11 = vpop.f32.mrb[23].mxu1  ;;  %1246 = vmatmul.mubr.bf16.vlgmr.msra.gmra.mrb[16].mxu0 %v655_v3  ;;  %v611_v13 = vmax.f32 %v503_v6, 0.0 }
 0x1cf   :  { %v498_v12 = vadd.f32 %v1660_v30, %v497_v11  ;;  %v609_v15 = vmax.f32 %v495_v8, 0.0 }
 0x1d0   :  { %v612_v14 = vmax.f32 %v506_v10, 0.0 }
 0x1d1   :  { %v610_v16 = vmax.f32 %v498_v12, 0.0 }
 0x1d2   :  { %v657_v17 = vpack.c.bf16 %v612_v14, %v611_v13 }
 0x1d3   :  { %v656_v18 = vpack.c.bf16 %v610_v16, %v609_v15  ;;  %v1207_v19 = vpop.f32.mrb[24].mxu1 }
 0x1d4   :  { %v519_v20 = vadd.f32 %v1207_v19, %v1660_v30  ;;  %v510_v21 = vpop.f32.mrb[25].mxu1 }
 0x1d5   :  { %v511_v22 = vadd.f32 %v1660_v30, %v510_v21  ;;  %v1208_v23 = vpop.f32.mrb[26].mxu1  ;;  %1249 = vmatprep.mubr.bf16.mxu0 %v656_v18 }
 0x1d6   :  { %v522_v24 = vadd.f32 %v1208_v23, %v1660_v30  ;;  %v513_v25 = vpop.f32.mrb[27].mxu1  ;;  %1250 = vmatmul.mubr.bf16.gmra.mrb[20].mxu0 %v657_v17  ;;  %v615_v27 = vmax.f32 %v519_v20, 0.0 }
 0x1d7   :  { %v514_v26 = vadd.f32 %v1660_v30, %v513_v25  ;;  %v613_v29 = vmax.f32 %v511_v22, 0.0 }
 0x1d8   :  { %v616_v28 = vmax.f32 %v522_v24, 0.0 }
 0x1d9   :  { %v614_v31 = vmax.f32 %v514_v26, 0.0 }
 0x1da   :  { %v659_v32 = vpack.c.bf16 %v616_v28, %v615_v27 }
 0x1db   :  { %v658_v34 = vpack.c.bf16 %v614_v31, %v613_v29  ;;  %v1211_v35 = vpop.f32.mrb[28].mxu1 }
 0x1dc   :  { %v535_v36 = vadd.f32 %v1211_v35, %v1660_v30  ;;  %v526_v37 = vpop.f32.mrb[29].mxu1 }
 0x1dd   :  { %v527_v38 = vadd.f32 %v1660_v30, %v526_v37  ;;  %v1212_v39 = vpop.f32.mrb[30].mxu1  ;;  %1253 = vmatprep.mubr.bf16.mxu0 %v658_v34 }
 0x1de   :  { %v538_v40 = vadd.f32 %v1212_v39, %v1660_v30  ;;  %v529_v41 = vpop.f32.mrb[31].mxu1  ;;  %1254 = vmatmul.mubr.bf16.gmra.mrb[24].mxu0 %v659_v32  ;;  %v619_v43 = vmax.f32 %v535_v36, 0.0 }
 0x1df   :  { %v530_v42 = vadd.f32 %v1660_v30, %v529_v41  ;;  %v617_v45 = vmax.f32 %v527_v38, 0.0 }
 0x1e0   :  { %v620_v44 = vmax.f32 %v538_v40, 0.0 }
 0x1e1   :  { %v618_v46 = vmax.f32 %v530_v42, 0.0  ;;  %v1697_v42 = vld [vmem:[%s1817_s6] ss:$0 sm:$0xff]  ;;  %s1396_s6 = smov [#allocation2]  }
 0x1e2   :  { %v661_v47 = vpack.c.bf16 %v620_v44, %v619_v43  ;;  %s1023_s10 = sshll.u32 %s1396_s6, 4  ;;  %s1024_s10 = int_to_ptr.vmem [resolvable:$true] %s1023_s10 }
 0x1e3   :  { %v660_v48 = vpack.c.bf16 %v618_v46, %v617_v45  ;;  %v1215_v49 = vpop.f32.mrb[32].mxu1  ;;  %v885_v46 = vlaneseq  ;;  %s1372_s11 = scalar_lea.vmem %s1024_s10, 4096  ;;  %p1377_p1 = scmp.lt.s32.totalorder %s1024_s10, %s1024_s10 }
 0x1e4   :  { %v551_v50 = vadd.f32 %v1215_v49, %v1660_v30  ;;  %v542_v51 = vpop.f32.mrb[33].mxu1  ;;  %p1373_p0 = scmp.ne.s32.totalorder %s1024_s10, %s1372_s11  ;;  %p1378_p2 = scmp.lt.s32.totalorder %s1372_s11, %s1372_s11 }
 0x1e5   :  { %v543_v52 = vadd.f32 %v1660_v30, %v542_v51  ;;  %v1216_v53 = vpop.f32.mrb[34].mxu1  ;;  %1257 = vmatprep.mubr.bf16.mxu0 %v660_v48 }
 0x1e6   :  { %v554_v2 = vadd.f32 %v1216_v53, %v1660_v30  ;;  %v545_v54 = vpop.f32.mrb[35].mxu1  ;;  %1258 = vmatmul.mubr.bf16.gmra.mrb[28].mxu0 %v661_v47  ;;  %v623_v55 = vmax.f32 %v551_v50, 0.0  ;;  %p1379_p3 = por %p1378_p2, %p1377_p1 }
 0x1e7   :  { %v546_v33 = vadd.f32 %v1660_v30, %v545_v54  ;;  %v621_v57 = vmax.f32 %v543_v52, 0.0 }
 0x1e8   :  { %v624_v56 = vmax.f32 %v554_v2, 0.0  ;;  %v886_v2 = vand.u32 127, %v885_v46  ;;  %p1380_p4 = pnand %p1379_p3, %p1373_p0 }
 0x1e9   :  { %v622_v58 = vmax.f32 %v546_v33, 0.0 }
 0x1ea   :  { %v663_v59 = vpack.c.bf16 %v624_v56, %v623_v55  ;;  %vm887_vm1 = vcmp.ge.s32.totalorder %v886_v2, 16  ;;  %vm888_vm2 = vcmp.lt.s32.totalorder %v886_v2, 32 }
 0x1eb   :  { %v662_v60 = vpack.c.bf16 %v622_v58, %v621_v57  ;;  %v1219_v61 = vpop.f32.mrb[36].mxu1  ;;  %vm1707_vm3 = vmand %vm887_vm1, %vm888_vm2 }
 0x1ec   :  { %v567_v62 = vadd.f32 %v1219_v61, %v1660_v30  ;;  %v558_v63 = vpop.f32.mrb[37].mxu1 }
 0x1ed   :  { %v559_v0 = vadd.f32 %v1660_v30, %v558_v63  ;;  %v1220_v1 = vpop.f32.mrb[38].mxu1  ;;  %1261 = vmatprep.mubr.bf16.mxu0 %v662_v60 }
 0x1ee   :  { %v570_v3 = vadd.f32 %v1220_v1, %v1660_v30  ;;  %v561_v4 = vpop.f32.mrb[39].mxu1  ;;  %1262 = vmatmul.mubr.bf16.gmra.mrb[32].mxu0 %v663_v59  ;;  %v627_v6 = vmax.f32 %v567_v62, 0.0 }
 0x1ef   :  { %v562_v5 = vadd.f32 %v1660_v30, %v561_v4  ;;  %v625_v8 = vmax.f32 %v559_v0, 0.0 }
 0x1f0   :  { %v628_v7 = vmax.f32 %v570_v3, 0.0 }
 0x1f1   :  { %v626_v9 = vmax.f32 %v562_v5, 0.0 }
 0x1f2   :  { %v665_v10 = vpack.c.bf16 %v628_v7, %v627_v6 }
 0x1f3   :  { %v664_v11 = vpack.c.bf16 %v626_v9, %v625_v8  ;;  %v1223_v12 = vpop.f32.mrb[40].mxu1 }
 0x1f4   :  { %v583_v13 = vadd.f32 %v1223_v12, %v1660_v30  ;;  %v574_v14 = vpop.f32.mrb[41].mxu1 }
 0x1f5   :  { %v575_v15 = vadd.f32 %v1660_v30, %v574_v14  ;;  %v1224_v16 = vpop.f32.mrb[42].mxu1  ;;  %1265 = vmatprep.mubr.bf16.mxu0 %v664_v11 }
 0x1f6   :  { %v586_v17 = vadd.f32 %v1224_v16, %v1660_v30  ;;  %v577_v18 = vpop.f32.mrb[43].mxu1  ;;  %1266 = vmatmul.mubr.bf16.gmra.mrb[36].mxu0 %v665_v10  ;;  %v631_v20 = vmax.f32 %v583_v13, 0.0 }
 0x1f7   :  { %v578_v19 = vadd.f32 %v1660_v30, %v577_v18  ;;  %v629_v22 = vmax.f32 %v575_v15, 0.0 }
 0x1f8   :  { %v632_v21 = vmax.f32 %v586_v17, 0.0 }
 0x1f9   :  { %v630_v23 = vmax.f32 %v578_v19, 0.0 }
 0x1fa   :  { %v667_v24 = vpack.c.bf16 %v632_v21, %v631_v20 }
 0x1fb   :  { %v666_v25 = vpack.c.bf16 %v630_v23, %v629_v22  ;;  %v1227_v26 = vpop.f32.mrb[44].mxu1 }
 0x1fc   :  { %v599_v27 = vadd.f32 %v1227_v26, %v1660_v30  ;;  %v590_v28 = vpop.f32.mrb[45].mxu1 }
 0x1fd   :  { %v591_v29 = vadd.f32 %v1660_v30, %v590_v28  ;;  %v1228_v31 = vpop.f32.mrb[46].mxu1  ;;  %1269 = vmatprep.mubr.bf16.mxu0 %v666_v25 }
 0x1fe   :  { %v602_v32 = vadd.f32 %v1228_v31, %v1660_v30  ;;  %v593_v34 = vpop.f32.mrb[47].mxu1  ;;  %1270 = vmatmul.mubr.bf16.gmra.mrb[40].mxu0 %v667_v24  ;;  %v635_v36 = vmax.f32 %v599_v27, 0.0 }
 0x1ff   :  { %v594_v35 = vadd.f32 %v1660_v30, %v593_v34  ;;  %v633_v38 = vmax.f32 %v591_v29, 0.0 }
 0x200   :  { %v636_v37 = vmax.f32 %v602_v32, 0.0 }
 0x201   :  { %v634_v39 = vmax.f32 %v594_v35, 0.0 }
 0x202   :  { %v669_v40 = vpack.c.bf16 %v636_v37, %v635_v36 }
 0x203   :  { %v668_v41 = vpack.c.bf16 %v634_v39, %v633_v38 }
 0x205   :  { %1273 = vmatprep.mubr.bf16.mxu0 %v668_v41 }
 0x206   :  { %1274 = vmatmul.mubr.bf16.gmra.mrb[44].mxu0 %v669_v40 }
 0x2a1   :  { %v1247_v43 = vpop.f32.mrb[16].mxu0 }
 0x2a2   :  { %v767_v44 = vadd.f32 %v1247_v43, %v1697_v42  ;;  %v758_v45 = vpop.f32.mrb[17].mxu0 }
 0x2a3   :  { %v759_v30 = vadd.f32 %v1697_v42, %v758_v45  ;;  %v1248_v47 = vpop.f32.mrb[18].mxu0 }
 0x2a4   :  { %v894_v48 = vmul.f32 1.442695, %v767_v44  ;;  %v770_v49 = vadd.f32 %v1248_v47, %v1697_v42  ;;  %v761_v50 = vpop.f32.mrb[19].mxu0 }
 0x2a5   :  { %v890_v51 = vmul.f32 1.442695, %v759_v30  ;;  %v762_v52 = vadd.f32 %v1697_v42, %v761_v50 }
 0x2a6   :  { %1308 = vpow2.f32 %v894_v48  ;;  %v896_v53 = vmul.f32 1.442695, %v770_v49 }
 0x2a7   :  { %1310 = vpow2.f32 %v890_v51  ;;  %v892_v54 = vmul.f32 1.442695, %v762_v52 }
 0x2a8   :  { %1312 = vpow2.f32 %v896_v53 }
 0x2a9   :  { %1314 = vpow2.f32 %v892_v54  ;;  %v1251_v33 = vpop.f32.mrb[20].mxu0 }
 0x2aa   :  { %v783_v55 = vadd.f32 %v1251_v33, %v1697_v42  ;;  %v774_v56 = vpop.f32.mrb[21].mxu0 }
 0x2ab   :  { %v775_v57 = vadd.f32 %v1697_v42, %v774_v56  ;;  %v1252_v58 = vpop.f32.mrb[22].mxu0 }
 0x2ac   :  { %v902_v59 = vmul.f32 1.442695, %v783_v55  ;;  %v786_v60 = vadd.f32 %v1252_v58, %v1697_v42  ;;  %v777_v61 = vpop.f32.mrb[23].mxu0 }
 0x2ad   :  { %v898_v62 = vmul.f32 1.442695, %v775_v57  ;;  %v778_v63 = vadd.f32 %v1697_v42, %v777_v61 }
 0x2ae   :  { %1316 = vpow2.f32 %v902_v59  ;;  %v904_v1 = vmul.f32 1.442695, %v786_v60 }
 0x2af   :  { %1318 = vpow2.f32 %v898_v62  ;;  %v900_v3 = vmul.f32 1.442695, %v778_v63 }
 0x2b0   :  { %v1309_v4 = vpop.eup %1308  ;;  %1320 = vpow2.f32 %v904_v1 }
 0x2b1   :  { %v1311_v5 = vpop.eup %1310  ;;  %v956_v6 = vsel %vm1707_vm3, %v1309_v4, %v767_v44  ;;  %1322 = vpow2.f32 %v900_v3  ;;  %v1255_v7 = vpop.f32.mrb[24].mxu0 }
 0x2b2   :  { %v1313_v8 = vpop.eup %1312  ;;  %988 = vst [vmem:[#allocation2 + $0x10] sm:$0xff] %v956_v6  ;;  %v954_v9 = vsel %vm1707_vm3, %v1311_v5, %v759_v30  ;;  %v799_v10 = vadd.f32 %v1255_v7, %v1697_v42  ;;  %v790_v11 = vpop.f32.mrb[25].mxu0 }
 0x2b3   :  { %v1315_v12 = vpop.eup %1314  ;;  %986 = vst [vmem:[#allocation2] sm:$0xff] %v954_v9  ;;  %v957_v13 = vsel %vm1707_vm3, %v1313_v8, %v770_v49  ;;  %v791_v14 = vadd.f32 %v1697_v42, %v790_v11  ;;  %v1256_v15 = vpop.f32.mrb[26].mxu0 }
 0x2b4   :  { %989 = vst [vmem:[#allocation2 + $0x18] sm:$0xff] %v957_v13  ;;  %v955_v16 = vsel %vm1707_vm3, %v1315_v12, %v762_v52  ;;  %v910_v17 = vmul.f32 1.442695, %v799_v10  ;;  %v802_v18 = vadd.f32 %v1256_v15, %v1697_v42  ;;  %v793_v19 = vpop.f32.mrb[27].mxu0 }
 0x2b5   :  { %987 = vst [vmem:[#allocation2 + $0x8] sm:$0xff] %v955_v16  ;;  %v906_v20 = vmul.f32 1.442695, %v791_v14  ;;  %v794_v21 = vadd.f32 %v1697_v42, %v793_v19 }
 0x2b6   :  { %1324 = vpow2.f32 %v910_v17  ;;  %v912_v22 = vmul.f32 1.442695, %v802_v18 }
 0x2b7   :  { %1326 = vpow2.f32 %v906_v20  ;;  %v908_v23 = vmul.f32 1.442695, %v794_v21 }
 0x2b8   :  { %v1317_v24 = vpop.eup %1316  ;;  %1328 = vpow2.f32 %v912_v22 }
 0x2b9   :  { %v1319_v25 = vpop.eup %1318  ;;  %v960_v26 = vsel %vm1707_vm3, %v1317_v24, %v783_v55  ;;  %1330 = vpow2.f32 %v908_v23  ;;  %v1259_v27 = vpop.f32.mrb[28].mxu0 }
 0x2ba   :  { %v1321_v28 = vpop.eup %1320  ;;  %992 = vst [vmem:[#allocation2 + $0x30] sm:$0xff] %v960_v26  ;;  %v958_v29 = vsel %vm1707_vm3, %v1319_v25, %v775_v57  ;;  %v815_v31 = vadd.f32 %v1259_v27, %v1697_v42  ;;  %v806_v32 = vpop.f32.mrb[29].mxu0 }
 0x2bb   :  { %v1323_v34 = vpop.eup %1322  ;;  %990 = vst [vmem:[#allocation2 + $0x20] sm:$0xff] %v958_v29  ;;  %v961_v35 = vsel %vm1707_vm3, %v1321_v28, %v786_v60  ;;  %v807_v36 = vadd.f32 %v1697_v42, %v806_v32  ;;  %v1260_v37 = vpop.f32.mrb[30].mxu0 }
 0x2bc   :  { %993 = vst [vmem:[#allocation2 + $0x38] sm:$0xff] %v961_v35  ;;  %v959_v38 = vsel %vm1707_vm3, %v1323_v34, %v778_v63  ;;  %v918_v39 = vmul.f32 1.442695, %v815_v31  ;;  %v818_v40 = vadd.f32 %v1260_v37, %v1697_v42  ;;  %v809_v41 = vpop.f32.mrb[31].mxu0 }
 0x2bd   :  { %991 = vst [vmem:[#allocation2 + $0x28] sm:$0xff] %v959_v38  ;;  %v914_v43 = vmul.f32 1.442695, %v807_v36  ;;  %v810_v44 = vadd.f32 %v1697_v42, %v809_v41 }
 0x2be   :  { %1332 = vpow2.f32 %v918_v39  ;;  %v920_v45 = vmul.f32 1.442695, %v818_v40 }
 0x2bf   :  { %1334 = vpow2.f32 %v914_v43  ;;  %v916_v46 = vmul.f32 1.442695, %v810_v44 }
 0x2c0   :  { %v1325_v30 = vpop.eup %1324  ;;  %1336 = vpow2.f32 %v920_v45 }
 0x2c1   :  { %v1327_v47 = vpop.eup %1326  ;;  %v964_v48 = vsel %vm1707_vm3, %v1325_v30, %v799_v10  ;;  %1338 = vpow2.f32 %v916_v46  ;;  %v1263_v49 = vpop.f32.mrb[32].mxu0 }
 0x2c2   :  { %v1329_v50 = vpop.eup %1328  ;;  %996 = vst [vmem:[#allocation2 + $0x50] sm:$0xff] %v964_v48  ;;  %v962_v51 = vsel %vm1707_vm3, %v1327_v47, %v791_v14  ;;  %v831_v52 = vadd.f32 %v1263_v49, %v1697_v42  ;;  %v822_v53 = vpop.f32.mrb[33].mxu0 }
 0x2c3   :  { %v1331_v2 = vpop.eup %1330  ;;  %994 = vst [vmem:[#allocation2 + $0x40] sm:$0xff] %v962_v51  ;;  %v965_v54 = vsel %vm1707_vm3, %v1329_v50, %v802_v18  ;;  %v823_v33 = vadd.f32 %v1697_v42, %v822_v53  ;;  %v1264_v55 = vpop.f32.mrb[34].mxu0 }
 0x2c4   :  { %997 = vst [vmem:[#allocation2 + $0x58] sm:$0xff] %v965_v54  ;;  %v963_v56 = vsel %vm1707_vm3, %v1331_v2, %v794_v21  ;;  %v926_v57 = vmul.f32 1.442695, %v831_v52  ;;  %v834_v58 = vadd.f32 %v1264_v55, %v1697_v42  ;;  %v825_v59 = vpop.f32.mrb[35].mxu0 }
 0x2c5   :  { %995 = vst [vmem:[#allocation2 + $0x48] sm:$0xff] %v963_v56  ;;  %v922_v60 = vmul.f32 1.442695, %v823_v33  ;;  %v826_v61 = vadd.f32 %v1697_v42, %v825_v59 }
 0x2c6   :  { %1340 = vpow2.f32 %v926_v57  ;;  %v928_v62 = vmul.f32 1.442695, %v834_v58 }
 0x2c7   :  { %1342 = vpow2.f32 %v922_v60  ;;  %v924_v63 = vmul.f32 1.442695, %v826_v61 }
 0x2c8   :  { %v1333_v1 = vpop.eup %1332  ;;  %1344 = vpow2.f32 %v928_v62 }
 0x2c9   :  { %v1335_v3 = vpop.eup %1334  ;;  %v968_v4 = vsel %vm1707_vm3, %v1333_v1, %v815_v31  ;;  %1346 = vpow2.f32 %v924_v63  ;;  %v1267_v5 = vpop.f32.mrb[36].mxu0 }
 0x2ca   :  { %v1337_v6 = vpop.eup %1336  ;;  %1000 = vst [vmem:[#allocation2 + $0x70] sm:$0xff] %v968_v4  ;;  %v966_v7 = vsel %vm1707_vm3, %v1335_v3, %v807_v36  ;;  %v847_v8 = vadd.f32 %v1267_v5, %v1697_v42  ;;  %v838_v9 = vpop.f32.mrb[37].mxu0 }
 0x2cb   :  { %v1339_v10 = vpop.eup %1338  ;;  %998 = vst [vmem:[#allocation2 + $0x60] sm:$0xff] %v966_v7  ;;  %v969_v11 = vsel %vm1707_vm3, %v1337_v6, %v818_v40  ;;  %v839_v12 = vadd.f32 %v1697_v42, %v838_v9  ;;  %v1268_v13 = vpop.f32.mrb[38].mxu0 }
 0x2cc   :  { %1001 = vst [vmem:[#allocation2 + $0x78] sm:$0xff] %v969_v11  ;;  %v967_v14 = vsel %vm1707_vm3, %v1339_v10, %v810_v44  ;;  %v934_v15 = vmul.f32 1.442695, %v847_v8  ;;  %v850_v16 = vadd.f32 %v1268_v13, %v1697_v42  ;;  %v841_v17 = vpop.f32.mrb[39].mxu0 }
 0x2cd   :  { %999 = vst [vmem:[#allocation2 + $0x68] sm:$0xff] %v967_v14  ;;  %v930_v18 = vmul.f32 1.442695, %v839_v12  ;;  %v842_v19 = vadd.f32 %v1697_v42, %v841_v17 }
 0x2ce   :  { %1348 = vpow2.f32 %v934_v15  ;;  %v936_v20 = vmul.f32 1.442695, %v850_v16 }
 0x2cf   :  { %1350 = vpow2.f32 %v930_v18  ;;  %v932_v21 = vmul.f32 1.442695, %v842_v19 }
 0x2d0   :  { %v1341_v22 = vpop.eup %1340  ;;  %1352 = vpow2.f32 %v936_v20 }
 0x2d1   :  { %v1343_v23 = vpop.eup %1342  ;;  %v972_v24 = vsel %vm1707_vm3, %v1341_v22, %v831_v52  ;;  %1354 = vpow2.f32 %v932_v21  ;;  %v1271_v25 = vpop.f32.mrb[40].mxu0 }
 0x2d2   :  { %v1345_v26 = vpop.eup %1344  ;;  %1004 = vst [vmem:[#allocation2 + $0x90] sm:$0xff] %v972_v24  ;;  %v970_v27 = vsel %vm1707_vm3, %v1343_v23, %v823_v33  ;;  %v863_v28 = vadd.f32 %v1271_v25, %v1697_v42  ;;  %v854_v29 = vpop.f32.mrb[41].mxu0 }
 0x2d3   :  { %v1347_v31 = vpop.eup %1346  ;;  %1002 = vst [vmem:[#allocation2 + $0x80] sm:$0xff] %v970_v27  ;;  %v973_v32 = vsel %vm1707_vm3, %v1345_v26, %v834_v58  ;;  %v855_v34 = vadd.f32 %v1697_v42, %v854_v29  ;;  %v1272_v35 = vpop.f32.mrb[42].mxu0 }
 0x2d4   :  { %1005 = vst [vmem:[#allocation2 + $0x98] sm:$0xff] %v973_v32  ;;  %v971_v36 = vsel %vm1707_vm3, %v1347_v31, %v826_v61  ;;  %v942_v37 = vmul.f32 1.442695, %v863_v28  ;;  %v866_v38 = vadd.f32 %v1272_v35, %v1697_v42  ;;  %v857_v39 = vpop.f32.mrb[43].mxu0 }
 0x2d5   :  { %1003 = vst [vmem:[#allocation2 + $0x88] sm:$0xff] %v971_v36  ;;  %v938_v40 = vmul.f32 1.442695, %v855_v34  ;;  %v858_v41 = vadd.f32 %v1697_v42, %v857_v39 }
 0x2d6   :  { %1356 = vpow2.f32 %v942_v37  ;;  %v944_v43 = vmul.f32 1.442695, %v866_v38 }
 0x2d7   :  { %1358 = vpow2.f32 %v938_v40  ;;  %v940_v44 = vmul.f32 1.442695, %v858_v41 }
 0x2d8   :  { %v1349_v45 = vpop.eup %1348  ;;  %1360 = vpow2.f32 %v944_v43 }
 0x2d9   :  { %v1351_v46 = vpop.eup %1350  ;;  %v976_v30 = vsel %vm1707_vm3, %v1349_v45, %v847_v8  ;;  %1362 = vpow2.f32 %v940_v44  ;;  %v1275_v47 = vpop.f32.mrb[44].mxu0 }
 0x2da   :  { %v1353_v48 = vpop.eup %1352  ;;  %1008 = vst [vmem:[#allocation2 + $0xb0] sm:$0xff] %v976_v30  ;;  %v974_v49 = vsel %vm1707_vm3, %v1351_v46, %v839_v12  ;;  %v879_v50 = vadd.f32 %v1275_v47, %v1697_v42  ;;  %v870_v51 = vpop.f32.mrb[45].mxu0 }
 0x2db   :  { %v1355_v52 = vpop.eup %1354  ;;  %1006 = vst [vmem:[#allocation2 + $0xa0] sm:$0xff] %v974_v49  ;;  %v977_v53 = vsel %vm1707_vm3, %v1353_v48, %v850_v16  ;;  %v871_v2 = vadd.f32 %v1697_v42, %v870_v51  ;;  %v1276_v54 = vpop.f32.mrb[46].mxu0 }
 0x2dc   :  { %1009 = vst [vmem:[#allocation2 + $0xb8] sm:$0xff] %v977_v53  ;;  %v975_v33 = vsel %vm1707_vm3, %v1355_v52, %v842_v19  ;;  %v950_v55 = vmul.f32 1.442695, %v879_v50  ;;  %v882_v56 = vadd.f32 %v1276_v54, %v1697_v42  ;;  %v873_v57 = vpop.f32.mrb[47].mxu0 }
 0x2dd   :  { %1007 = vst [vmem:[#allocation2 + $0xa8] sm:$0xff] %v975_v33  ;;  %v946_v58 = vmul.f32 1.442695, %v871_v2  ;;  %v874_v59 = vadd.f32 %v1697_v42, %v873_v57 }
 0x2de   :  { %1364 = vpow2.f32 %v950_v55  ;;  %v952_v60 = vmul.f32 1.442695, %v882_v56 }
 0x2df   :  { %1366 = vpow2.f32 %v946_v58  ;;  %v948_v61 = vmul.f32 1.442695, %v874_v59 }
 0x2e0   :  { %v1357_v62 = vpop.eup %1356  ;;  %1368 = vpow2.f32 %v952_v60 }
 0x2e1   :  { %v1359_v63 = vpop.eup %1358  ;;  %v980_v1 = vsel %vm1707_vm3, %v1357_v62, %v863_v28  ;;  %1370 = vpow2.f32 %v948_v61 }
 0x2e2   :  { %v1361_v3 = vpop.eup %1360  ;;  %1012 = vst [vmem:[#allocation2 + $0xd0] sm:$0xff] %v980_v1  ;;  %v978_v4 = vsel %vm1707_vm3, %v1359_v63, %v855_v34 }
 0x2e3   :  { %v1363_v5 = vpop.eup %1362  ;;  %1010 = vst [vmem:[#allocation2 + $0xc0] sm:$0xff] %v978_v4  ;;  %v981_v42 = vsel %vm1707_vm3, %v1361_v3, %v866_v38 }
 0x2e4   :  { %1013 = vst [vmem:[#allocation2 + $0xd8] sm:$0xff] %v981_v42  ;;  %v979_v6 = vsel %vm1707_vm3, %v1363_v5, %v858_v41 }
 0x2e5   :  { %1011 = vst [vmem:[#allocation2 + $0xc8] sm:$0xff] %v979_v6 }
 0x2e8   :  { %v1365_v7 = vpop.eup %1364 }
 0x2e9   :  { %v1367_v8 = vpop.eup %1366  ;;  %v984_v9 = vsel %vm1707_vm3, %v1365_v7, %v879_v50 }
 0x2ea   :  { %v1369_v10 = vpop.eup %1368  ;;  %1016 = vst [vmem:[#allocation2 + $0xf0] sm:$0xff] %v984_v9  ;;  %v982_v11 = vsel %vm1707_vm3, %v1367_v8, %v871_v2 }
 0x2eb   :  { %v1371_v12 = vpop.eup %1370  ;;  %1014 = vst [vmem:[#allocation2 + $0xe0] sm:$0xff] %v982_v11  ;;  %v985_v13 = vsel %vm1707_vm3, %v1369_v10, %v882_v56 }
 0x2ec   :  { %1017 = vst [vmem:[#allocation2 + $0xf8] sm:$0xff] %v985_v13  ;;  %v983_v14 = vsel %vm1707_vm3, %v1371_v12, %v874_v59 }
 0x2ed   :  { %1015 = vst [vmem:[#allocation2 + $0xe8] sm:$0xff] %v983_v14 }
 0x2ee   :  { %1383 = shalt.err (!%p1380_p4)
}
 0x2ef   :  { %s1384_s14 = scalar_lea.hbm %s1818_s7, 4096 }
 0x2f0   :  { %p1385_p5 = scmp.ne.s32.totalorder %s1818_s7, %s1384_s14  ;;  %p1388_p6 = scmp.lt.u32.totalorder %s1384_s14, %s1818_s7 }
 0x2f2   :  { %p1390_p7 = pnand %p1388_p6, %p1385_p5 }
 0x2f4   :  { %1393 = shalt.err (!%p1390_p7)
}
 0x2f5   :  { %s1397_s18 = smov 128   ;;  %s1398_s19 = smov 8  }
 0x2f6   :  { %1029 = dma.vmem_to_hbm [thread:$0]  %s1024_s10, 4096, %s1818_s7, [#allocation3], %s1397_s18, %s1397_s18, %s1398_s19  }
 0x2f7   :  { %1394 = dma.done.wait [#allocation3], 4096  }
 0x2f8   :  { %1395 = vsyncadd [#allocation3], 4294963200 }
 0x2f9   :  { %1033 = vsyncpa [#allocation3], 1 }

</bundles_post_ra>
